<compile_context>
chip_gen: v6e
topology: v6e:2x2x1
jax: 0.10.0
libtpu: 0.0.40
codegen_flags: <defaults>
</compile_context>

<pallas_src>
import jax
import jax.numpy as jnp
from jax.experimental import pallas as pl
from jax.experimental.pallas import tpu as pltpu


_LANES = 1024          # lane-dense block width (multiple of 128)
_MAX_BLOCK_ROWS = 512  # 512 x 1024 f32 = 2 MiB per input block (4 bufs -> 8 MiB)


def _round_up(v, m):
    return ((v + m - 1) // m) * m


def _sublane_multiple(dtype):
    # sublane packing: f32 -> 8, bf16/f16 -> 16, int8/fp8 -> 32
    return {4: 8, 2: 16, 1: 32}.get(jnp.dtype(dtype).itemsize, 8)


def _mse_partial_kernel(x_ref, y_ref, o_ref, acc_ref):
    """Accumulate per-lane partial sums of (y - x)^2 for one parallel slice."""
    k = pl.program_id(1)

    @pl.when(k == 0)
    def _():
        acc_ref[...] = jnp.zeros_like(acc_ref)

    diff = y_ref[...].astype(jnp.float32) - x_ref[...].astype(jnp.float32)
    sq = diff * diff
    br, c = sq.shape
    # Lane/sublane-preserving partial reduction: (br, c) -> (8, c).  The
    # reshape only splits the sublane axis at a multiple of 8 (no relayout)
    # and the axis-0 sum is plain elementwise VPU adds hidden under the DMA.
    acc_ref[...] += jnp.sum(sq.reshape(br // 8, 8, c), axis=0)

    @pl.when(k == pl.num_programs(1) - 1)
    def _():
        o_ref[...] = acc_ref[...]


def reconstruction_loss(x, x_recont):
    """mean((x_recont - x.view(B, -1))**2), returned as an f32 scalar."""
    assert x.size == x_recont.size, "numel mismatch"
    n = x.size

    c = _LANES
    row_mult = max(_sublane_multiple(x.dtype), _sublane_multiple(x_recont.dtype))
    rows = -(-n // c)                                   # ceil(n / c)
    br = min(_MAX_BLOCK_ROWS, _round_up(rows, row_mult))

    # Split across (up to) two TensorCores when there is enough work.
    num_blocks = -(-rows // br)
    p = 2 if num_blocks >= 2 else 1
    rows_padded = _round_up(rows, p * br)
    num_blocks = rows_padded // br
    kk = num_blocks // p                                # reduction steps per slice

    n_padded = rows_padded * c
    xf = jnp.ravel(x)
    yf = jnp.ravel(x_recont)
    if n_padded != n:
        # Zero padding contributes 0 to the sum of squared differences.
        xf = jnp.pad(xf, (0, n_padded - n))
        yf = jnp.pad(yf, (0, n_padded - n))
    x2 = xf.reshape(rows_padded, c)
    y2 = yf.reshape(rows_padded, c)

    in_map = lambda pi, ki: (pi * kk + ki, 0)
    out_map = lambda pi, ki: (pi, 0)

    partials = pl.pallas_call(
        _mse_partial_kernel,
        out_shape=jax.ShapeDtypeStruct((p * 8, c), jnp.float32),
        grid_spec=pltpu.PrefetchScalarGridSpec(
            num_scalar_prefetch=0,
            grid=(p, kk),
            in_specs=[
                pl.BlockSpec((br, c), in_map),
                pl.BlockSpec((br, c), in_map),
            ],
            out_specs=pl.BlockSpec((8, c), out_map),
            scratch_shapes=[pltpu.VMEM((8, c), jnp.float32)],
        ),
        compiler_params=pltpu.CompilerParams(
            dimension_semantics=("parallel", "arbitrary"),
        ),
    )(x2, y2)

    # Tiny final reduction + mean outside the kernel (true numel, not padded).
    return jnp.sum(partials) / jnp.float32(n)


if __name__ == "__main__":
    key = jax.random.PRNGKey(0)
    k1, k2 = jax.random.split(key)

    # x: image batch NCHW (2, 4, 16, 16); x_recont: flattened reconstruction (2, 1024)
    x = jax.random.normal(k1, (2, 4, 16, 16), dtype=jnp.float32)
    x_recont = jax.random.normal(k2, (2, 4 * 16 * 16), dtype=jnp.float32)

    loss = reconstruction_loss(x, x_recont)
    jax.block_until_ready(loss)

    # Reference check against plain JAX.
    ref = jnp.mean((x_recont - x.reshape(x_recont.shape[0], -1)) ** 2)
    assert jnp.allclose(loss, ref, rtol=1e-5, atol=1e-5), (loss, ref)

    print("KERNEL_OK")
</pallas_src>

<mosaic_0001>
module attributes {stable_mosaic.version = 11 : i64} {
  func.func @_mse_partial_kernel(%arg0: i32, %arg1: i32, %arg2: memref<8x1024xf32, #tpu.memory_space<vmem>>, %arg3: memref<8x1024xf32, #tpu.memory_space<vmem>>, %arg4: memref<8x1024xf32, #tpu.memory_space<vmem>>, %arg5: memref<8x1024xf32, #tpu.memory_space<vmem>>) attributes {dimension_semantics = [#tpu.dimension_semantics<parallel>, #tpu.dimension_semantics<arbitrary>], iteration_bounds = array<i64: 1, 1>, scalar_prefetch = 0 : i64, scratch_operands = 1 : i64, tpu.core_type = #tpu.core_type<tc>, window_params = [{transform_indices = @transform_0, window_bounds = array<i64: 8, 1024>}, {transform_indices = @transform_1, window_bounds = array<i64: 8, 1024>}, {transform_indices = @transform_2, window_bounds = array<i64: 8, 1024>}]} {
    %c0_i32 = arith.constant 0 : i32
    %0 = arith.cmpi eq, %arg1, %c0_i32 : i32
    %1 = arith.extui %0 : i1 to i32
    %c0_i32_0 = arith.constant 0 : i32
    %2 = arith.cmpi ne, %1, %c0_i32_0 : i32
    scf.if %2 {
      %cst_10 = arith.constant 0.000000e+00 : f32
      %15 = vector.broadcast %cst_10 : f32 to vector<8x1024xf32>
      %c0_11 = arith.constant 0 : index
      %c0_12 = arith.constant 0 : index
      %16 = vector.load %arg5[%c0_11, %c0_12] : memref<8x1024xf32, #tpu.memory_space<vmem>>, vector<8x1024xf32>
      tpu.vector_store %arg5[%c0_11, %c0_12], %15 {strides = array<i32>} : memref<8x1024xf32, #tpu.memory_space<vmem>>, vector<8x1024xf32>,
    } else {
    }
    %c0 = arith.constant 0 : index
    %c0_1 = arith.constant 0 : index
    %3 = vector.load %arg3[%c0, %c0_1] : memref<8x1024xf32, #tpu.memory_space<vmem>>, vector<8x1024xf32>
    %c0_2 = arith.constant 0 : index
    %c0_3 = arith.constant 0 : index
    %4 = vector.load %arg2[%c0_2, %c0_3] : memref<8x1024xf32, #tpu.memory_space<vmem>>, vector<8x1024xf32>
    %5 = arith.subf %3, %4 : vector<8x1024xf32>
    %6 = arith.mulf %5, %5 : vector<8x1024xf32>
    %c0_4 = arith.constant 0 : index
    %c0_5 = arith.constant 0 : index
    %7 = vector.load %arg5[%c0_4, %c0_5] : memref<8x1024xf32, #tpu.memory_space<vmem>>, vector<8x1024xf32>
    %8 = vector.shape_cast %6 : vector<8x1024xf32> to vector<1x8x1024xf32>
    %cst = arith.constant dense<0.000000e+00> : vector<8x1024xf32>
    %9 = vector.multi_reduction <add>, %8, %cst [0] : vector<1x8x1024xf32> to vector<8x1024xf32>
    %10 = arith.addf %7, %9 : vector<8x1024xf32>
    %c0_6 = arith.constant 0 : index
    %c0_7 = arith.constant 0 : index
    %11 = vector.load %arg5[%c0_6, %c0_7] : memref<8x1024xf32, #tpu.memory_space<vmem>>, vector<8x1024xf32>
    tpu.vector_store %arg5[%c0_6, %c0_7], %10 {strides = array<i32>} : memref<8x1024xf32, #tpu.memory_space<vmem>>, vector<8x1024xf32>,
    %c0_i32_8 = arith.constant 0 : i32
    %12 = arith.cmpi eq, %arg1, %c0_i32_8 : i32
    %13 = arith.extui %12 : i1 to i32
    %c0_i32_9 = arith.constant 0 : i32
    %14 = arith.cmpi ne, %13, %c0_i32_9 : i32
    scf.if %14 {
      %c0_10 = arith.constant 0 : index
      %c0_11 = arith.constant 0 : index
      %15 = vector.load %arg5[%c0_10, %c0_11] : memref<8x1024xf32, #tpu.memory_space<vmem>>, vector<8x1024xf32>
      %c0_12 = arith.constant 0 : index
      %c0_13 = arith.constant 0 : index
      %16 = vector.load %arg4[%c0_12, %c0_13] : memref<8x1024xf32, #tpu.memory_space<vmem>>, vector<8x1024xf32>
      tpu.vector_store %arg4[%c0_12, %c0_13], %15 {strides = array<i32>} : memref<8x1024xf32, #tpu.memory_space<vmem>>, vector<8x1024xf32>,
    } else {
    }
    return
  }
  func.func @transform_0(%arg0: i32, %arg1: i32) -> (i32, i32) {
    %c1_i32 = arith.constant 1 : i32
    %0 = arith.muli %arg0, %c1_i32 : i32
    %1 = arith.addi %0, %arg1 : i32
    %c0_i32 = arith.constant 0 : i32
    %c0_i32_0 = arith.constant 0 : i32
    return %1, %c0_i32 : i32, i32
  }
  func.func @transform_1(%arg0: i32, %arg1: i32) -> (i32, i32) {
    %c1_i32 = arith.constant 1 : i32
    %0 = arith.muli %arg0, %c1_i32 : i32
    %1 = arith.addi %0, %arg1 : i32
    %c0_i32 = arith.constant 0 : i32
    %c0_i32_0 = arith.constant 0 : i32
    return %1, %c0_i32 : i32, i32
  }
  func.func @transform_2(%arg0: i32, %arg1: i32) -> (i32, i32) {
    %c0_i32 = arith.constant 0 : i32
    %c0_i32_0 = arith.constant 0 : i32
    return %arg0, %c0_i32 : i32, i32
  }
}

</mosaic_0001>

<bundles_post_ra>
// kernel: tpu_custom_call.1
= control target key start
LH: loop header
LB: loop body
LE: loop exit
PB: predicated region body
PF: predicated region fallthrough
CT: control target
= control target key end

     0   :  { %7 = vsyncpa [#allocation4], 0  ;;  %s253_s0 = inlined_call_operand.hbm [shape: f32[8,1024], index: 0, kind: input, shape index: {}]   ;;  %s254_s1 = inlined_call_operand.hbm [shape: f32[8,1024], index: 1, kind: input, shape index: {}]   ;;  %s255_s2 = inlined_call_operand.hbm [shape: f32[8,1024], index: 2, kind: output, shape index: {}]  }
   0x1   :  { %8 = vsyncpa [#allocation7], 0 }
   0x2   :  { %9 = vsyncpa [#allocation5], 0  ;;  %s226_s9 = smov [#allocation3]   ;;  %s227_s11 = smov [#allocation6]  }
   0x3   :  { %s20_s10 = sshll.u32 %s226_s9, 4  ;;  %s34_s12 = sshll.u32 %s227_s11, 4  ;;  %s21_s10 = int_to_ptr.vmem [resolvable:$true] %s20_s10  ;;  %s35_s12 = int_to_ptr.vmem [resolvable:$true] %s34_s12 }
   0x4   :  { %s168_s13 = scalar_lea.vmem %s21_s10, 1024  ;;  %p173_p1 = scmp.lt.s32.totalorder %s21_s10, %s21_s10 }
   0x5   :  { %p169_p0 = scmp.ne.s32.totalorder %s21_s10, %s168_s13  ;;  %p174_p2 = scmp.lt.s32.totalorder %s168_s13, %s168_s13 }
   0x7   :  { %p175_p3 = por %p174_p2, %p173_p1 }
   0x9   :  { %p176_p4 = pnand %p175_p3, %p169_p0 }
   0xb   :  { %179 = shalt.err (!%p176_p4)
}
   0xc   :  { %23 = dma.hbm_to_vmem [thread:$0]  %s253_s0, 1024, %s21_s10, [#allocation4]  }
   0xd   :  { %s188_s16 = scalar_lea.vmem %s35_s12, 1024  ;;  %p193_p6 = scmp.lt.s32.totalorder %s35_s12, %s35_s12 }
   0xe   :  { %p189_p5 = scmp.ne.s32.totalorder %s35_s12, %s188_s16  ;;  %p194_p7 = scmp.lt.s32.totalorder %s188_s16, %s188_s16 }
  0x10   :  { %p195_p8 = por %p194_p7, %p193_p6 }
  0x12   :  { %p196_p9 = pnand %p195_p8, %p189_p5 }
  0x14   :  { %199 = shalt.err (!%p196_p9)
}
  0x15   :  { %37 = dma.hbm_to_vmem [thread:$0]  %s254_s1, 1024, %s35_s12, [#allocation7]  }
  0x16   :  { %220 = dma.done.wait [#allocation4], 1024  }
  0x17   :  { %221 = vsyncadd [#allocation4], 4294966272 }
  0x18   :  { %222 = dma.done.wait [#allocation7], 1024  }
  0x19   :  { %223 = vsyncadd [#allocation7], 4294966272  ;;  %v58_v0 = vld [vmem:[#allocation6] sm:$0xff]  ;;  %v59_v2 = vld [vmem:[#allocation6 + $0x8] sm:$0xff]  ;;  %s228_s0 = smov [#allocation8]  }
  0x1a   :  { %v66_v1 = vld [vmem:[#allocation3] sm:$0xff]  ;;  %v67_v4 = vld [vmem:[#allocation3 + $0x8] sm:$0xff]  ;;  %v60_v5 = vld [vmem:[#allocation6 + $0x10] sm:$0xff]  ;;  %s147_s1 = sshll.u32 %s228_s0, 4  ;;  %s148_s1 = int_to_ptr.vmem [resolvable:$true] %s147_s1 }
  0x1b   :  { %v74_v3 = vsub.f32 %v58_v0, %v66_v1  ;;  %v68_v6 = vld [vmem:[#allocation3 + $0x10] sm:$0xff]  ;;  %v75_v7 = vsub.f32 %v59_v2, %v67_v4  ;;  %v61_v9 = vld [vmem:[#allocation6 + $0x18] sm:$0xff]  ;;  %v62_v11 = vld [vmem:[#allocation6 + $0x20] sm:$0xff]  ;;  %s200_s19 = scalar_lea.vmem %s148_s1, 1024  ;;  %p205_p11 = scmp.lt.s32.totalorder %s148_s1, %s148_s1 }
  0x1c   :  { %v76_v8 = vsub.f32 %v60_v5, %v68_v6  ;;  %v69_v10 = vld [vmem:[#allocation3 + $0x18] sm:$0xff]  ;;  %v70_v14 = vld [vmem:[#allocation3 + $0x20] sm:$0xff]  ;;  %v63_v15 = vld [vmem:[#allocation6 + $0x28] sm:$0xff]  ;;  %p201_p10 = scmp.ne.s32.totalorder %s148_s1, %s200_s19  ;;  %p206_p12 = scmp.lt.s32.totalorder %s200_s19, %s200_s19 }
  0x1d   :  { %v82_v12 = vmul.f32 %v74_v3, %v74_v3  ;;  %v77_v13 = vsub.f32 %v61_v9, %v69_v10  ;;  %v71_v16 = vld [vmem:[#allocation3 + $0x28] sm:$0xff]  ;;  %v83_v17 = vmul.f32 %v75_v7, %v75_v7  ;;  %v78_v19 = vsub.f32 %v62_v11, %v70_v14  ;;  %v64_v21 = vld [vmem:[#allocation6 + $0x30] sm:$0xff]  ;;  %v65_v23 = vld [vmem:[#allocation6 + $0x38] sm:$0xff] }
  0x1e   :  { %v84_v18 = vmul.f32 %v76_v8, %v76_v8  ;;  %v79_v20 = vsub.f32 %v63_v15, %v71_v16  ;;  %v72_v22 = vld [vmem:[#allocation3 + $0x30] sm:$0xff]  ;;  %v73_v26 = vld [vmem:[#allocation3 + $0x38] sm:$0xff]  ;;  %p207_p13 = por %p206_p12, %p205_p11 }
  0x1f   :  { %133 = vst [vmem:[#allocation8] sm:$0xff] %v82_v12  ;;  %v85_v24 = vmul.f32 %v77_v13, %v77_v13  ;;  %v80_v25 = vsub.f32 %v64_v21, %v72_v22  ;;  %134 = vst [vmem:[#allocation8 + $0x8] sm:$0xff] %v83_v17  ;;  %v86_v27 = vmul.f32 %v78_v19, %v78_v19 }
  0x20   :  { %135 = vst [vmem:[#allocation8 + $0x10] sm:$0xff] %v84_v18  ;;  %v87_v28 = vmul.f32 %v79_v20, %v79_v20  ;;  %v81_v29 = vsub.f32 %v65_v23, %v73_v26  ;;  %p208_p0 = pnand %p207_p13, %p201_p10 }
  0x21   :  { %136 = vst [vmem:[#allocation8 + $0x18] sm:$0xff] %v85_v24  ;;  %v88_v30 = vmul.f32 %v80_v25, %v80_v25  ;;  %137 = vst [vmem:[#allocation8 + $0x20] sm:$0xff] %v86_v27 }
  0x22   :  { %138 = vst [vmem:[#allocation8 + $0x28] sm:$0xff] %v87_v28  ;;  %v89_v31 = vmul.f32 %v81_v29, %v81_v29 }
  0x23   :  { %139 = vst [vmem:[#allocation8 + $0x30] sm:$0xff] %v88_v30 }
  0x24   :  { %140 = vst [vmem:[#allocation8 + $0x38] sm:$0xff] %v89_v31 }
  0x25   :  { %211 = shalt.err (!%p208_p0)
}
  0x26   :  { %150 = dma.vmem_to_hbm [thread:$0]  %s148_s1, 1024, %s255_s2, [#allocation5]  }
  0x27   :  { %224 = dma.done.wait [#allocation5], 1024  }
  0x28   :  { %225 = vsyncadd [#allocation5], 4294966272 }
  0x29   :  { %154 = vsyncpa [#allocation4], 1 }
  0x2a   :  { %155 = vsyncpa [#allocation7], 1 }
  0x2b   :  { %156 = vsyncpa [#allocation5], 1 }

</bundles_post_ra>
